<compile_context>
chip_gen: v5e
topology: v5e:2x2
jax: 0.10.0
libtpu: 0.0.40
codegen_flags: <defaults>
</compile_context>

<pallas_src>
import functools
import math

import jax
import jax.numpy as jnp
from jax import lax
from jax.experimental import pallas as pl
from jax.experimental.pallas import tpu as pltpu


def _round_up(x: int, m: int) -> int:
    return ((x + m - 1) // m) * m


# f32 elements per input block (~2 MiB). 2 inputs x 2 double-buffers -> ~8 MiB resident,
# well under the scoped VMEM limit on every generation (incl. v7x's 32 MiB).
_VMEM_BLOCK_ELEM_BUDGET = 512 * 1024


# ---------------------------------------------------------------------------
# ndim >= 3 path: inputs reshaped to (N, C, HW); softmax over C (sublanes),
# spatial on lanes. Grid = (N, num_hw_tiles); resident (1, 1) accumulator.
# ---------------------------------------------------------------------------
def _kldiv_kernel_chw(out_logits_ref, tar_logits_ref, loss_ref, *,
                      hw, tile_hw, total, mask_lanes):
    n = pl.program_id(0)
    h = pl.program_id(1)

    @pl.when(jnp.logical_and(n == 0, h == 0))
    def _init():
        loss_ref[...] = jnp.zeros_like(loss_ref)

    x = out_logits_ref[0].astype(jnp.float32)   # (C, TILE_HW) -> log_softmax
    t = tar_logits_ref[0].astype(jnp.float32)   # (C, TILE_HW) -> softmax

    # log_softmax(outputs) over the channel axis (axis 0)
    x_shift = x - jnp.max(x, axis=0, keepdims=True)
    x_lse = jnp.log(jnp.sum(jnp.exp(x_shift), axis=0, keepdims=True))
    log_p = x_shift - x_lse

    # softmax(targets) over the channel axis, with 1/sum factored out per column
    t_shift = t - jnp.max(t, axis=0, keepdims=True)
    t_exp = jnp.exp(t_shift)
    t_sum = jnp.sum(t_exp, axis=0, keepdims=True)          # (1, TILE_HW)
    log_q = t_shift - jnp.log(t_sum)

    # sum_c q_c*(log q_c - log p_c) == (1/t_sum) * sum_c t_exp_c*(log q_c - log p_c)
    col = jnp.sum(t_exp * (log_q - log_p), axis=0, keepdims=True)
    col = col * pl.reciprocal(t_sum, approx=True)           # EUP, once per column

    if mask_lanes:  # static: only emitted when the last HW tile is padded
        lane = lax.broadcasted_iota(jnp.int32, col.shape, 1)
        col = jnp.where(h * tile_hw + lane < hw, col, 0.0)

    loss_ref[...] += jnp.sum(col)

    @pl.when(jnp.logical_and(n == pl.num_programs(0) - 1,
                             h == pl.num_programs(1) - 1))
    def _finalize():
        loss_ref[...] = loss_ref[...] / float(total)        # mean over ALL elements


# ---------------------------------------------------------------------------
# ndim == 2 path: (N, C), softmax over the last axis (lanes); tile over rows.
# ---------------------------------------------------------------------------
def _kldiv_kernel_rows(out_logits_ref, tar_logits_ref, loss_ref, *,
                       n_rows, tile_m, total, mask_rows):
    i = pl.program_id(0)

    @pl.when(i == 0)
    def _init():
        loss_ref[...] = jnp.zeros_like(loss_ref)

    x = out_logits_ref[...].astype(jnp.float32)   # (TILE_M, C)
    t = tar_logits_ref[...].astype(jnp.float32)

    x_shift = x - jnp.max(x, axis=-1, keepdims=True)
    x_lse = jnp.log(jnp.sum(jnp.exp(x_shift), axis=-1, keepdims=True))
    log_p = x_shift - x_lse

    t_shift = t - jnp.max(t, axis=-1, keepdims=True)
    t_exp = jnp.exp(t_shift)
    t_sum = jnp.sum(t_exp, axis=-1, keepdims=True)          # (TILE_M, 1)
    log_q = t_shift - jnp.log(t_sum)

    row = jnp.sum(t_exp * (log_q - log_p), axis=-1, keepdims=True)
    row = row * pl.reciprocal(t_sum, approx=True)

    if mask_rows:
        ridx = lax.broadcasted_iota(jnp.int32, row.shape, 0)
        row = jnp.where(i * tile_m + ridx < n_rows, row, 0.0)

    loss_ref[...] += jnp.sum(row)

    @pl.when(i == pl.num_programs(0) - 1)
    def _finalize():
        loss_ref[...] = loss_ref[...] / float(total)


def kldiv_loss(outputs, targets):
    """KLDivLoss(reduction='mean')(log_softmax(outputs, dim=1), softmax(targets, dim=1))."""
    assert outputs.shape == targets.shape
    assert outputs.ndim >= 2

    if outputs.ndim == 2:
        n_rows, c = outputs.shape
        budget_m = (_VMEM_BLOCK_ELEM_BUDGET // max(c, 1)) // 8 * 8
        tile_m = max(8, min(_round_up(n_rows, 8), budget_m))
        kernel = functools.partial(
            _kldiv_kernel_rows, n_rows=n_rows, tile_m=tile_m,
            total=n_rows * c, mask_rows=(n_rows % tile_m != 0))
        loss = pl.pallas_call(
            kernel,
            out_shape=jax.ShapeDtypeStruct((1, 1), jnp.float32),
            grid=(pl.cdiv(n_rows, tile_m),),
            in_specs=[pl.BlockSpec((tile_m, c), lambda i: (i, 0)),
                      pl.BlockSpec((tile_m, c), lambda i: (i, 0))],
            out_specs=pl.BlockSpec((1, 1), lambda i: (0, 0)),
            compiler_params=pltpu.CompilerParams(
                dimension_semantics=("arbitrary",)),
        )(outputs, targets)
        return loss[0, 0]

    # ndim >= 3: channels-first (N, C, *spatial). Free reshape, no transpose.
    n, c = outputs.shape[0], outputs.shape[1]
    hw = int(math.prod(outputs.shape[2:]))
    o3 = outputs.reshape(n, c, hw)
    t3 = targets.reshape(n, c, hw)

    budget_hw = (_VMEM_BLOCK_ELEM_BUDGET // max(c, 1)) // 128 * 128
    tile_hw = max(128, min(_round_up(hw, 128), budget_hw))
    num_hw = pl.cdiv(hw, tile_hw)

    kernel = functools.partial(
        _kldiv_kernel_chw, hw=hw, tile_hw=tile_hw,
        total=n * c * hw, mask_lanes=(hw % tile_hw != 0))
    loss = pl.pallas_call(
        kernel,
        out_shape=jax.ShapeDtypeStruct((1, 1), jnp.float32),
        grid=(n, num_hw),
        in_specs=[pl.BlockSpec((1, c, tile_hw), lambda i, j: (i, 0, j)),
                  pl.BlockSpec((1, c, tile_hw), lambda i, j: (i, 0, j))],
        out_specs=pl.BlockSpec((1, 1), lambda i, j: (0, 0)),
        compiler_params=pltpu.CompilerParams(
            dimension_semantics=("arbitrary", "arbitrary")),
    )(o3, t3)
    return loss[0, 0]


if __name__ == "__main__":
    key = jax.random.PRNGKey(0)
    k1, k2 = jax.random.split(key)
    # Small NCHW inputs: batch=2, channels=4, spatial=16x16 (softmax over dim=1)
    outputs = jax.random.normal(k1, (2, 4, 16, 16), dtype=jnp.float32)
    targets = jax.random.normal(k2, (2, 4, 16, 16), dtype=jnp.float32)

    loss = kldiv_loss(outputs, targets)
    jax.block_until_ready(loss)

    # Sanity check against a pure-JAX reference (generous tolerance for approx recip).
    ref = jnp.mean(
        jax.nn.softmax(targets, axis=1)
        * (jax.nn.log_softmax(targets, axis=1) - jax.nn.log_softmax(outputs, axis=1)))
    assert jnp.allclose(loss, ref, rtol=1e-2, atol=1e-5), (loss, ref)

    print("KERNEL_OK")
</pallas_src>

<mosaic_0001>
module attributes {stable_mosaic.version = 11 : i64} {
  func.func @_kldiv_kernel_chw(%arg0: i32, %arg1: i32, %arg2: memref<1x4x256xf32, #tpu.memory_space<vmem>>, %arg3: memref<1x4x256xf32, #tpu.memory_space<vmem>>, %arg4: memref<1x1xf32, #tpu.memory_space<vmem>>) attributes {dimension_semantics = [#tpu.dimension_semantics<arbitrary>, #tpu.dimension_semantics<arbitrary>], iteration_bounds = array<i64: 2, 1>, scalar_prefetch = 0 : i64, scratch_operands = 0 : i64, tpu.core_type = #tpu.core_type<tc>, window_params = [{transform_indices = @transform_0, window_bounds = array<i64: 1, 4, 256>}, {transform_indices = @transform_1, window_bounds = array<i64: 1, 4, 256>}, {pipeline_mode = #tpu.pipeline_mode<synchronous>, transform_indices = @transform_2, window_bounds = array<i64: 1, 1>}]} {
    %c0_i32 = arith.constant 0 : i32
    %0 = arith.cmpi eq, %arg0, %c0_i32 : i32
    %c0_i32_0 = arith.constant 0 : i32
    %1 = arith.cmpi eq, %arg1, %c0_i32_0 : i32
    %2 = arith.andi %0, %1 : i1
    %3 = arith.extui %2 : i1 to i32
    %c0_i32_1 = arith.constant 0 : i32
    %4 = arith.cmpi ne, %3, %c0_i32_1 : i32
    scf.if %4 {
      %cst_18 = arith.constant 0.000000e+00 : f32
      %48 = vector.broadcast %cst_18 : f32 to vector<1x1xf32>
      %c0_19 = arith.constant 0 : index
      %c0_20 = arith.constant 0 : index
      %49 = vector.load %arg4[%c0_19, %c0_20] : memref<1x1xf32, #tpu.memory_space<vmem>>, vector<1x1xf32>
      tpu.vector_store %arg4[%c0_19, %c0_20], %48 {strides = array<i32>} : memref<1x1xf32, #tpu.memory_space<vmem>>, vector<1x1xf32>,
    } else {
    }
    %c0 = arith.constant 0 : index
    %c0_2 = arith.constant 0 : index
    %c0_3 = arith.constant 0 : index
    %5 = vector.load %arg2[%c0, %c0_2, %c0_3] : memref<1x4x256xf32, #tpu.memory_space<vmem>>, vector<1x4x256xf32>
    %6 = vector.shape_cast %5 : vector<1x4x256xf32> to vector<4x256xf32>
    %c0_4 = arith.constant 0 : index
    %c0_5 = arith.constant 0 : index
    %c0_6 = arith.constant 0 : index
    %7 = vector.load %arg3[%c0_4, %c0_5, %c0_6] : memref<1x4x256xf32, #tpu.memory_space<vmem>>, vector<1x4x256xf32>
    %8 = vector.shape_cast %7 : vector<1x4x256xf32> to vector<4x256xf32>
    %cst = arith.constant dense<0xFF800000> : vector<256xf32>
    %9 = vector.multi_reduction <maximumf>, %6, %cst [0] : vector<4x256xf32> to vector<256xf32>
    %10 = vector.shape_cast %9 : vector<256xf32> to vector<1x256xf32>
    %11 = vector.broadcast %10 : vector<1x256xf32> to vector<4x256xf32>
    %12 = arith.subf %6, %11 : vector<4x256xf32>
    %13 = math.exp %12 : vector<4x256xf32>
    %cst_7 = arith.constant dense<0.000000e+00> : vector<256xf32>
    %14 = vector.multi_reduction <add>, %13, %cst_7 [0] : vector<4x256xf32> to vector<256xf32>
    %15 = vector.shape_cast %14 : vector<256xf32> to vector<1x256xf32>
    %16 = math.log %15 : vector<1x256xf32>
    %17 = vector.broadcast %16 : vector<1x256xf32> to vector<4x256xf32>
    %18 = arith.subf %12, %17 : vector<4x256xf32>
    %cst_8 = arith.constant dense<0xFF800000> : vector<256xf32>
    %19 = vector.multi_reduction <maximumf>, %8, %cst_8 [0] : vector<4x256xf32> to vector<256xf32>
    %20 = vector.shape_cast %19 : vector<256xf32> to vector<1x256xf32>
    %21 = vector.broadcast %20 : vector<1x256xf32> to vector<4x256xf32>
    %22 = arith.subf %8, %21 : vector<4x256xf32>
    %23 = math.exp %22 : vector<4x256xf32>
    %cst_9 = arith.constant dense<0.000000e+00> : vector<256xf32>
    %24 = vector.multi_reduction <add>, %23, %cst_9 [0] : vector<4x256xf32> to vector<256xf32>
    %25 = vector.shape_cast %24 : vector<256xf32> to vector<1x256xf32>
    %26 = math.log %25 : vector<1x256xf32>
    %27 = vector.broadcast %26 : vector<1x256xf32> to vector<4x256xf32>
    %28 = arith.subf %22, %27 : vector<4x256xf32>
    %29 = arith.subf %28, %18 : vector<4x256xf32>
    %30 = arith.mulf %23, %29 : vector<4x256xf32>
    %cst_10 = arith.constant dense<0.000000e+00> : vector<256xf32>
    %31 = vector.multi_reduction <add>, %30, %cst_10 [0] : vector<4x256xf32> to vector<256xf32>
    %32 = vector.shape_cast %31 : vector<256xf32> to vector<1x256xf32>
    %33 = tpu.reciprocal %25 {approx = true} : vector<1x256xf32> -> vector<1x256xf32>
    %34 = arith.mulf %32, %33 : vector<1x256xf32>
    %c0_11 = arith.constant 0 : index
    %c0_12 = arith.constant 0 : index
    %35 = vector.load %arg4[%c0_11, %c0_12] : memref<1x1xf32, #tpu.memory_space<vmem>>, vector<1x1xf32>
    %36 = vector.shape_cast %34 : vector<1x256xf32> to vector<1x1x256xf32>
    %cst_13 = arith.constant dense<0.000000e+00> : vector<1xf32>
    %37 = vector.multi_reduction <add>, %36, %cst_13 [1, 2] : vector<1x1x256xf32> to vector<1xf32>
    %38 = vector.shape_cast %37 : vector<1xf32> to vector<1x1x1xf32>
    %39 = vector.extract %38[0, 0, 0] : f32 from vector<1x1x1xf32>
    %40 = vector.broadcast %39 : f32 to vector<1x1xf32>
    %41 = arith.addf %35, %40 : vector<1x1xf32>
    %c0_14 = arith.constant 0 : index
    %c0_15 = arith.constant 0 : index
    %42 = vector.load %arg4[%c0_14, %c0_15] : memref<1x1xf32, #tpu.memory_space<vmem>>, vector<1x1xf32>
    tpu.vector_store %arg4[%c0_14, %c0_15], %41 {strides = array<i32>} : memref<1x1xf32, #tpu.memory_space<vmem>>, vector<1x1xf32>,
    %c1_i32 = arith.constant 1 : i32
    %43 = arith.cmpi eq, %arg0, %c1_i32 : i32
    %c0_i32_16 = arith.constant 0 : i32
    %44 = arith.cmpi eq, %arg1, %c0_i32_16 : i32
    %45 = arith.andi %43, %44 : i1
    %46 = arith.extui %45 : i1 to i32
    %c0_i32_17 = arith.constant 0 : i32
    %47 = arith.cmpi ne, %46, %c0_i32_17 : i32
    scf.if %47 {
      %c0_18 = arith.constant 0 : index
      %c0_19 = arith.constant 0 : index
      %48 = vector.load %arg4[%c0_18, %c0_19] : memref<1x1xf32, #tpu.memory_space<vmem>>, vector<1x1xf32>
      %cst_20 = arith.constant 2.048000e+03 : f32
      %49 = vector.broadcast %cst_20 : f32 to vector<1x1xf32>
      %50 = arith.divf %48, %49 : vector<1x1xf32>
      %c0_21 = arith.constant 0 : index
      %c0_22 = arith.constant 0 : index
      %51 = vector.load %arg4[%c0_21, %c0_22] : memref<1x1xf32, #tpu.memory_space<vmem>>, vector<1x1xf32>
      tpu.vector_store %arg4[%c0_21, %c0_22], %50 {strides = array<i32>} : memref<1x1xf32, #tpu.memory_space<vmem>>, vector<1x1xf32>,
    } else {
    }
    return
  }
  func.func @transform_0(%arg0: i32, %arg1: i32) -> (i32, i32, i32) {
    %c0_i32 = arith.constant 0 : i32
    %c0_i32_0 = arith.constant 0 : i32
    return %arg0, %c0_i32, %arg1 : i32, i32, i32
  }
  func.func @transform_1(%arg0: i32, %arg1: i32) -> (i32, i32, i32) {
    %c0_i32 = arith.constant 0 : i32
    %c0_i32_0 = arith.constant 0 : i32
    return %arg0, %c0_i32, %arg1 : i32, i32, i32
  }
  func.func @transform_2(%arg0: i32, %arg1: i32) -> (i32, i32) {
    %c0_i32 = arith.constant 0 : i32
    %c0_i32_0 = arith.constant 0 : i32
    %c0_i32_1 = arith.constant 0 : i32
    return %c0_i32, %c0_i32_0 : i32, i32
  }
}

</mosaic_0001>

<bundles_post_ra>
// kernel: tpu_custom_call.1
= control target key start
LH: loop header
LB: loop body
LE: loop exit
PB: predicated region body
PF: predicated region fallthrough
CT: control target
= control target key end

     0   :  { %7 = vsyncpa [#allocation3], 0  ;;  %s894_s0 = inlined_call_operand.hbm [shape: f32[2,4,256], index: 0, kind: input, shape index: {}]   ;;  %s895_s1 = inlined_call_operand.hbm [shape: f32[2,4,256], index: 1, kind: input, shape index: {}]   ;;  %s896_s2 = inlined_call_operand.hbm [shape: f32[1,1], index: 2, kind: output, shape index: {}]  }
   0x1   :  { %9 = vsyncpa [#allocation3 + $0x1], 0 }
   0x2   :  { %10 = vsyncpa [#allocation6], 0 }
   0x3   :  { %12 = vsyncpa [#allocation6 + $0x1], 0 }
   0x4   :  { %13 = vsyncpa [#allocation4], 0  ;;  %s772_s9 = smov 0   ;;  %s774_s10 = smov 0  }
   0x5   :  { %s776_s11 = smov 0   ;;  %s778_s12 = smov 0  }
   0x6   :  { %s780_s13 = smov 0   ;;  %s782_s14 = smov 0  }
   0x7 LB: > { %s495_s15 = sadd.s32 4294967295, %s752_s14   ;;  %s31_s16 = sadd.s32 1, %s748_s13  ;;  %s752_s14 = sphi %s782_s14, %s19_s14   ;;  %s748_s13 = sphi %s780_s13, %s903_s13   ;;  %s744_s12 = sphi %s778_s12, %s902_s12   ;;  %s740_s11 = sphi %s776_s11, %s901_s11   ;;  %s736_s10 = sphi %s774_s10, %s900_s10   ;;  %s732_s9 = sphi %s772_s9, %s899_s9  }
   0x8   : > { %p33_p0 = scmp.ge.s32.totalorder %s31_s16, 2  ;;  %s40_s17 = sadd.s32 1, %s740_s11 }
   0x9   : > { %p47_p1 = scmp.ne.s32.totalorder %s740_s11, %s736_s10  ;;  %p48_p2 = scmp.eq.s32.totalorder %s752_s14, 0 }
   0xa   : > { %s905_s16 = smov (%p33_p0, %s31_s16), 0  ;;  %p53_p4 = scmp.ne.s32.totalorder %s736_s10, %s732_s9 }
   0xb   : > { %p808_p3 = por %p48_p2, %p47_p1  ;;  %s35_s19 = ssub.s32 %s748_s13, %s905_s16 }
   0xc   : > { %p54_p5 = scmp.eq.s32.totalorder %s495_s15, 0  ;;  %p38_p6 = scmp.eq.s32.totalorder %s35_s19, 0 }
   0xd   : > { %p534_p8 = scmp.lt.s32.totalorder %s752_s14, 2  ;;  %s126_s22 = sand.u32 1, %s740_s11  }
   0xe   : > { %p817_p7 = por %p54_p5, %p53_p4  ;;  %s513_s23 = sshll.u32 %s748_s13, 3 }
   0xf   : > { %s823_s21 = scalar_select %p38_p6, %s740_s11, %s40_s17  }
  0x10   : > { %s498_s24 = sshll.u32 %s126_s22, 3  ;;  %s137_s27 = scalar_lea.hbm %s894_s0, %s513_s23 }
  0x11   : > { %s139_s28 = sshll.u32 %s137_s27, 4  ;;  %s130_s29 = scalar_lea.vmem [#allocation2], %s498_s24  ;;  %s140_s28 = int_to_ptr.hbm [resolvable:$true] %s139_s28 }
  0x12   : > { %s141_s30 = sshll.u32 %s130_s29, 4  ;;  %p528_p9 = pnand %p534_p8, %p808_p3  ;;  %s142_s30 = int_to_ptr.vmem [resolvable:$true] %s141_s30 }
  0x13   : > { %p504_p10 = scmp.ge.s32.totalorder %s752_s14, 1  ;;  %p168_p11 = scmp.lt.s32.totalorder %s752_s14, 3 }
  0x14   : > { %s127_s3 = scalar_lea.sflag [#allocation3], %s126_s22  ;;  %s159_s6 = scalar_lea.hbm %s895_s1, %s513_s23 }
  0x15   : > { %530 = dma.hbm_to_vmem [thread:$0]  (!%p528_p9), %s140_s28, 128, %s142_s30, %s127_s3  }
  0x16   : > { %p169_p12 = pnand %p504_p10, %p168_p11  ;;  %s161_s7 = sshll.u32 %s159_s6, 4  ;;  %s162_s7 = int_to_ptr.hbm [resolvable:$true] %s161_s7 }
  0x17   : > { %s152_s8 = scalar_lea.vmem [#allocation5], %s498_s24  ;;  %s149_s17 = scalar_lea.sflag [#allocation6], %s126_s22 }
  0x18   : > { %s163_s9 = sshll.u32 %s152_s8, 4  ;;  %172 = sbr.rel (%p169_p12) target bundleno = 382 (0x17e), region = 28  ;;  %s164_s9 = int_to_ptr.vmem [resolvable:$true] %s163_s9 }
  0x19   : > { %533 = dma.hbm_to_vmem [thread:$0]  (!%p528_p9), %s162_s7, 128, %s164_s9, %s149_s17  }
  0x1a   : > { %s174_s18 = sand.u32 (!%p169_p12), 1, %s736_s10  }
  0x1b   : > { %s505_s19 = sshll.u32 (!%p169_p12), %s174_s18, 3  ;;  %s175_s25 = scalar_lea.sflag (!%p169_p12), [#allocation3], %s174_s18 }
  0x1c   : > { %s178_s26 = scalar_lea.vmem (!%p169_p12), [#allocation2], %s505_s19 }
  0x1d   : > { %719 = dma.done.wait (%p817_p7), %s175_s25, 128  }
  0x1e   : > { %721 = vsyncadd (%p817_p7), %s175_s25, 4294967168  ;;  %s185_s23 = scalar_lea.sflag [#allocation6], %s174_s18  ;;  %s842_s24 = scalar_lea.vmem [#allocation5], %s505_s19 }
  0x1f   : > { %723 = dma.done.wait (%p817_p7), %s185_s23, 128  }
  0x20   : > { %725 = vsyncadd (%p817_p7), %s185_s23, 4294967168  ;;  %p212_p13 = scmp.eq.s32.totalorder %s744_s12, 0 }
  0x21   : > { %vm218_vm0 = vcmask (%p212_p13), 0   ;;  %v754_v0 = vmov (%p212_p13), 0.0  }
  0x22   : > { %217 = sbr.rel (!%p212_p13) target bundleno = 39 (0x27), region = 40  ;;  %219 = vst.msk [vmem:[#allocation7] sm:$0x1] (%p212_p13), %vm218_vm0, %v754_v0 }
  0x27 PF: > { %v220_v1 = vld [vmem:[%s178_s26] sm:$0xff]  ;;  %vm228_vm1 = vcmask 1043456   ;;  %v221_v23 = vld [vmem:[%s842_s24] sm:$0xff]  ;;  %vm366_vm2 = vcmask 1040384   ;;  %p383_p0 = scmp.eq.s32.totalorder %s744_s12, 1  ;;  %vm381_vm3 = vcmask 0  }
  0x28   : > { %223 = vst [vmem:[#allocation1] ss:$2 sm:$0xff] %v220_v1 }
  0x2f   : > { %v224_v2 = vld.sshfl [vmem:[#allocation1] sm:$0xff pattern:$0x75316420]  ;;  %v225_v3 = vld.sshfl [vmem:[#allocation1 + $0x8] sm:$0xff pattern:$0x75316420] }
  0x30   : > { %v229_v4 = vsel %vm228_vm1, %v224_v2, -inf  ;;  %v236_v5 = vsel %vm228_vm1, %v225_v3, -inf }
  0x31   : > { %v230_v6 = vrot.slane %v229_v4, 4  ;;  %v237_v7 = vrot.slane %v236_v5, 4 }
  0x33   : > { %v231_v8 = vmax.f32 %v229_v4, %v230_v6  ;;  %v238_v9 = vmax.f32 %v236_v5, %v237_v7 }
  0x35   : > { %v232_v10 = vrot.slane %v231_v8, 2  ;;  %v239_v11 = vrot.slane %v238_v9, 2 }
  0x37   : > { %v233_v12 = vmax.f32 %v231_v8, %v232_v10  ;;  %v240_v13 = vmax.f32 %v238_v9, %v239_v11 }
  0x39   : > { %v234_v14 = vrot.slane %v233_v12, 1  ;;  %v241_v15 = vrot.slane %v240_v13, 1 }
  0x3b   : > { %v235_v16 = vmax.f32 %v233_v12, %v234_v14  ;;  %v242_v17 = vmax.f32 %v240_v13, %v241_v15 }
  0x3d   : > { %v245_v18 = vrot.slane %v242_v17, 4 }
  0x3f   : > { %v246_v19 = vsel %vm228_vm1, %v235_v16, %v245_v18 }
  0x40   : > { %v852_v20 = vsub.f32 %v220_v1, %v246_v19 }
  0x42   : > { %v249_v21 = vmul.f32 1.442695, %v852_v20 }
  0x44   : > { %588 = vpow2.f32 %v249_v21 }
  0x4a   : > { %v589_v22 = vpop.eup %588 }
  0x4b   : > { %252 = vst [vmem:[#allocation1] ss:$2 sm:$0xff] %v589_v22 }
  0x52   : > { %v253_v24 = vld.sshfl [vmem:[#allocation1] sm:$0xff pattern:$0x75316420]  ;;  %v254_v25 = vld.sshfl [vmem:[#allocation1 + $0x8] sm:$0xff pattern:$0x75316420] }
  0x53   : > { %282 = vst [vmem:[#allocation1] ss:$2 sm:$0xff] %v221_v23  ;;  %v264_v42 = vsel %vm228_vm1, %v254_v25, 0.0  ;;  %v257_v46 = vsel %vm228_vm1, %v253_v24, 0.0 }
  0x54   : > { %v265_v44 = vrot.slane %v264_v42, 4  ;;  %v258_v49 = vrot.slane %v257_v46, 4 }
  0x56   : > { %v266_v50 = vadd.f32 %v265_v44, %v264_v42  ;;  %v259_v51 = vadd.f32 %v258_v49, %v257_v46 }
  0x58   : > { %v267_v52 = vrot.slane %v266_v50, 2  ;;  %v260_v54 = vrot.slane %v259_v51, 2 }
  0x5a   : > { %v283_v26 = vld.sshfl [vmem:[#allocation1] sm:$0xff pattern:$0x75316420]  ;;  %v284_v27 = vld.sshfl [vmem:[#allocation1 + $0x8] sm:$0xff pattern:$0x75316420]  ;;  %v268_v55 = vadd.f32 %v267_v52, %v266_v50  ;;  %v261_v56 = vadd.f32 %v260_v54, %v259_v51 }
  0x5b   : > { %v287_v28 = vsel %vm228_vm1, %v283_v26, -inf  ;;  %v294_v29 = vsel %vm228_vm1, %v284_v27, -inf }
  0x5c   : > { %v288_v30 = vrot.slane %v287_v28, 4  ;;  %v295_v31 = vrot.slane %v294_v29, 4  ;;  %v269_v57 = vrot.slane %v268_v55, 1  ;;  %v262_v60 = vrot.slane %v261_v56, 1 }
  0x5e   : > { %v289_v32 = vmax.f32 %v287_v28, %v288_v30  ;;  %v296_v33 = vmax.f32 %v294_v29, %v295_v31  ;;  %v270_v61 = vadd.f32 %v269_v57, %v268_v55  ;;  %v263_v4 = vadd.f32 %v262_v60, %v261_v56 }
  0x60   : > { %v290_v34 = vrot.slane %v289_v32, 2  ;;  %v297_v35 = vrot.slane %v296_v33, 2 }
  0x62   : > { %v291_v36 = vmax.f32 %v289_v32, %v290_v34  ;;  %v298_v37 = vmax.f32 %v296_v33, %v297_v35 }
  0x64   : > { %v292_v38 = vrot.slane %v291_v36, 1  ;;  %v299_v39 = vrot.slane %v298_v37, 1 }
  0x66   : > { %v293_v40 = vmax.f32 %v291_v36, %v292_v38  ;;  %v300_v41 = vmax.f32 %v298_v37, %v299_v39 }
  0x68   : > { %v303_v43 = vrot.slane %v300_v41, 4 }
  0x6a   : > { %v304_v45 = vsel %vm228_vm1, %v293_v40, %v303_v43 }
  0x6b   : > { %v306_v47 = vsub.f32 %v221_v23, %v304_v45 }
  0x6d   : > { %v307_v48 = vmul.f32 1.442695, %v306_v47 }
  0x6f   : > { %590 = vpow2.f32 %v307_v48 }
  0x70   : > { %592 = vlog2.f32 %v270_v61 }
  0x71   : > { %594 = vlog2.f32 %v263_v4 }
  0x75   : > { %v591_v53 = vpop.eup %590 }
  0x76   : > { %310 = vst [vmem:[#allocation1] ss:$2 sm:$0xff] %v591_v53  ;;  %v593_v11 = vpop.eup %592 }
  0x77   : > { %v274_v14 = vmul.f32 0.6931472, %v593_v11  ;;  %v595_v15 = vpop.eup %594 }
  0x78   : > { %v272_v16 = vmul.f32 0.6931472, %v595_v15 }
  0x79   : > { %v277_v17 = vrot.slane %v274_v14, 4 }
  0x7b   : > { %v278_v21 = vsel %vm228_vm1, %v272_v16, %v277_v17 }
  0x7c   : > { %v280_v25 = vsub.f32 %v852_v20, %v278_v21 }
  0x7d   : > { %v311_v58 = vld.sshfl [vmem:[#allocation1] sm:$0xff pattern:$0x75316420]  ;;  %v312_v59 = vld.sshfl [vmem:[#allocation1 + $0x8] sm:$0xff pattern:$0x75316420] }
  0x7e   : > { %v315_v62 = vsel %vm228_vm1, %v311_v58, 0.0  ;;  %v322_v63 = vsel %vm228_vm1, %v312_v59, 0.0  ;;  %v365_v59 = vld [vmem:[#allocation7] sm:$0x1] }
  0x7f   : > { %v316_v0 = vrot.slane %v315_v62, 4  ;;  %v323_v1 = vrot.slane %v322_v63, 4 }
  0x81   : > { %v317_v2 = vadd.f32 %v316_v0, %v315_v62  ;;  %v324_v3 = vadd.f32 %v323_v1, %v322_v63  ;;  %v755_v62 = vmov (%p383_p0), 2048.0  }
  0x83   : > { %v318_v5 = vrot.slane %v317_v2, 2  ;;  %v325_v6 = vrot.slane %v324_v3, 2 }
  0x85   : > { %v319_v7 = vadd.f32 %v318_v5, %v317_v2  ;;  %v326_v8 = vadd.f32 %v325_v6, %v324_v3 }
  0x87   : > { %v320_v9 = vrot.slane %v319_v7, 1  ;;  %v327_v10 = vrot.slane %v326_v8, 1 }
  0x89   : > { %v321_v12 = vadd.f32 %v320_v9, %v319_v7  ;;  %v328_v13 = vadd.f32 %v327_v10, %v326_v8 }
  0x8b   : > { %596 = vlog2.f32 %v321_v12 }
  0x8c   : > { %598 = vlog2.f32 %v328_v13 }
  0x8d   : > { %600 = vrcp.f32 %v321_v12 }
  0x8e   : > { %602 = vrcp.f32 %v328_v13 }
  0x8f   : > { %604 = vrcp.f32 (%p383_p0), %v755_v62 }
  0x91   : > { %v597_v18 = vpop.eup %596 }
  0x92   : > { %v599_v19 = vpop.eup %598  ;;  %v330_v22 = vmul.f32 0.6931472, %v597_v18 }
  0x93   : > { %v332_v23 = vmul.f32 0.6931472, %v599_v19  ;;  %v601_v41 = vpop.eup %600 }
  0x94   : > { %v603_v44 = vpop.eup %602 }
  0x95   : > { %v335_v24 = vrot.slane %v332_v23, 4  ;;  %v605_v63 = vpop.eup (%p383_p0), %604 }
  0x96   : > { %v390_v0 = vmul.f32 (%p383_p0), 2048.0, %v605_v63  ;;  %vm394_vm4 = vweird.f32 (%p383_p0), %v605_v63 }
  0x97   : > { %v336_v26 = vsel %vm228_vm1, %v330_v22, %v335_v24 }
  0x98   : > { %v338_v27 = vsub.f32 %v306_v47, %v336_v26  ;;  %v391_v1 = vsub.f32 (%p383_p0), 1.0, %v390_v0 }
  0x9a   : > { %v339_v28 = vsub.f32 %v338_v27, %v280_v25  ;;  %v392_v2 = vmul.f32 (%p383_p0), %v605_v63, %v391_v1 }
  0x9c   : > { %v340_v29 = vmul.f32 %v591_v53, %v339_v28  ;;  %v393_v4 = vadd.f32 (%p383_p0), %v605_v63, %v392_v2 }
  0x9e   : > { %342 = vst [vmem:[#allocation1] ss:$2 sm:$0xff] %v340_v29  ;;  %v395_v5 = vsel (%p383_p0), %vm394_vm4, %v605_v63, %v393_v4 }
  0xa5   : > { %v343_v30 = vld.sshfl [vmem:[#allocation1] sm:$0xff pattern:$0x75316420]  ;;  %v344_v31 = vld.sshfl [vmem:[#allocation1 + $0x8] sm:$0xff pattern:$0x75316420] }
  0xa6   : > { %v347_v32 = vsel %vm228_vm1, %v343_v30, 0.0  ;;  %v354_v33 = vsel %vm228_vm1, %v344_v31, 0.0 }
  0xa7   : > { %v348_v34 = vrot.slane %v347_v32, 4  ;;  %v355_v35 = vrot.slane %v354_v33, 4 }
  0xa9   : > { %v349_v36 = vadd.f32 %v348_v34, %v347_v32  ;;  %v356_v37 = vadd.f32 %v355_v35, %v354_v33 }
  0xab   : > { %v350_v38 = vrot.slane %v349_v36, 2  ;;  %v357_v20 = vrot.slane %v356_v37, 2 }
  0xad   : > { %v351_v39 = vadd.f32 %v350_v38, %v349_v36  ;;  %v358_v40 = vadd.f32 %v357_v20, %v356_v37 }
  0xaf   : > { %v352_v42 = vrot.slane %v351_v39, 1  ;;  %v359_v43 = vrot.slane %v358_v40, 1 }
  0xb1   : > { %v353_v45 = vadd.f32 %v352_v42, %v351_v39  ;;  %v360_v46 = vadd.f32 %v359_v43, %v358_v40 }
  0xb3   : > { %v363_v47 = vmul.f32 %v601_v41, %v353_v45  ;;  %v364_v48 = vmul.f32 %v603_v44, %v360_v46 }
  0xb5   : > { %v367_v49 = vsel %vm366_vm2, %v363_v47, 0.0  ;;  %v368_v50 = vsel %vm366_vm2, %v364_v48, 0.0 }
  0xb6   : > { %v369_v51 = vadd.f32 %v368_v50, %v367_v49 }
  0xb8   : > { %370 = vadd.xlane.f32.xlu0 %v369_v51 }
 0x12b   : > { %v371_v52 = vpop.xlane.xlu0 %370 }
 0x12c   : > { %v372_v53 = vrot.slane %v371_v52, 4 }
 0x12e   : > { %v373_v54 = vadd.f32 %v372_v53, %v371_v52 }
 0x130   : > { %v374_v55 = vrot.slane %v373_v54, 2 }
 0x132   : > { %v375_v56 = vadd.f32 %v374_v55, %v373_v54 }
 0x134   : > { %v376_v57 = vrot.slane %v375_v56, 1 }
 0x136   : > { %v377_v58 = vadd.f32 %v376_v57, %v375_v56 }
 0x138   : > { %517 = vpush %v377_v58 }
 0x169   : > { %s518_s20 = spop %517  ;;  %387 = sbr.rel (!%p383_p0) target bundleno = 376 (0x178), region = 44 }
 0x16a   : > { %v379_v60 = vstv %s518_s20 }
 0x16b   : > { %v380_v61 = vadd.f32 %v379_v60, %v365_v59 }
 0x16d   : > { %382 = vst.msk [vmem:[#allocation7] sm:$0x1] %vm381_vm3, %v380_v61 }
 0x174   : > { %v388_v3 = vld [vmem:[#allocation7] sm:$0x1] }
 0x175   : > { %v396_v6 = vmul.f32 %v395_v5, %v388_v3 }
 0x177   : > { %397 = vst.msk [vmem:[#allocation7] sm:$0x1] %vm381_vm3, %v396_v6 }
 0x178 PF: > { %p535_p1 = scmp.eq.s32.totalorder %s495_s15, 1  ;;  %s406_s12 = sshll.u32 %s896_s2, 4  ;;  %s407_s12 = int_to_ptr.hbm [resolvable:$true] %s406_s12 }
 0x179   : > { %s756_s28 = smov [#allocation7]  }
 0x17a   : > { %s404_s29 = sshll.u32 %s756_s28, 4  ;;  %s405_s29 = int_to_ptr.vmem [resolvable:$true] %s404_s29 }
 0x17b   : > { %524 = dma.vmem_to_hbm [thread:$0]  (%p535_p1), %s405_s29, 16, %s407_s12, [#allocation4]  }
 0x17c   : > { %727 = dma.done.wait (%p535_p1), [#allocation4], 16  }
 0x17d   : > { %729 = vsyncadd (%p535_p1), [#allocation4], 4294967280 }
 0x17e PF: > { %s19_s14 = sadd.s32 1, %s752_s14   ;;  %s899_s9 = smov %s736_s10 }
 0x17f   : > { %p16_p2 = scmp.ge.s32.totalorder %s19_s14, 4   ;;  %s900_s10 = smov %s740_s11 }
 0x180   : > { %s901_s11 = smov %s823_s21  ;;  %s902_s12 = smov %s748_s13 }
 0x181   : > { %s903_s13 = smov %s905_s16  ;;  %18 = sbr.rel (!%p16_p2) target bundleno = 7 (0x7), region = 86 }
 0x186   :  { %420 = vsyncpa [#allocation3], 1 }
 0x187   :  { %422 = vsyncpa [#allocation3 + $0x1], 1 }
 0x188   :  { %423 = vsyncpa [#allocation6], 1 }
 0x189   :  { %425 = vsyncpa [#allocation6 + $0x1], 1 }
 0x18a   :  { %426 = vsyncpa [#allocation4], 1 }
 0x18b   :  { %428 = vsyncpa [#allocation4 + $0x1], 1 }

</bundles_post_ra>
